<compile_context>
chip_gen: v7x
topology: tpu7x:2x2x1
jax: 0.10.0
libtpu: 0.0.40
codegen_flags: <defaults>
</compile_context>

<pallas_src>
import math

import jax
import jax.numpy as jnp
from jax.experimental import pallas as pl
from jax.experimental.pallas import tpu as pltpu

MIN_FP16 = float(jnp.finfo(jnp.float16).min)   # matches torch.finfo(torch.float16).min
LN_EPS = 1e-12

try:  # derive VMEM budget from the chip (v5e/v6e: 128 MiB phys, v7x: 64 MiB)
    _VMEM_PHYS = int(pltpu.get_tpu_info().vmem_capacity_bytes)
except Exception:  # pragma: no cover - conservative fallback
    _VMEM_PHYS = 64 * 1024 * 1024
VMEM_LIMIT = max(32 * 1024 * 1024, min((_VMEM_PHYS * 3) // 4, 96 * 1024 * 1024))

ROW_TILE = 256      # token-row tile for LN / matmul kernels
ATTN_TILE = 256     # query / key tile for flash attention (auto-shrunk if VMEM-tight)
FF_TILE = 512       # streamed d_ff tile for the MLP
VOCAB_TILE = 4096   # decoder vocab tile


def _divisor_tile(n, cap, align):
    """Largest multiple of `align` that divides n and is <= cap (falls back to n)."""
    if n <= cap:
        return n
    t = (cap // align) * align
    while t >= align:
        if n % t == 0:
            return t
        t -= align
    return n


def _buffered_spec(block_shape, index_map, nbuf):
    """BlockSpec with deeper pipelining when the installed Pallas supports it."""
    try:
        return pl.BlockSpec(block_shape, index_map, pipeline_mode=pl.Buffered(nbuf))
    except (TypeError, AttributeError):
        return pl.BlockSpec(block_shape, index_map)


def _resident(shape):
    nd = len(shape)
    return pl.BlockSpec(shape, lambda *_, _nd=nd: (0,) * _nd)


def _vec(p):
    return p.reshape(1, -1)


def _layernorm(x, w, b):
    # NOTE: the reference divides by (var + eps) WITHOUT sqrt -- reproduced exactly.
    m = jnp.mean(x, axis=-1, keepdims=True)
    var = jnp.mean((x - m) ** 2, axis=-1, keepdims=True)
    return w * (x - m) / (var + LN_EPS) + b


# ------------------------------------------------------------------
# Kernel A: ln1 + fused QKV projection (one full-D matmul per row tile).
# proj_w columns are pre-permuted to [Q head-major | K | V] so the q/k/v slices
# below are D-aligned, lane-dense.  Q is written pre-scaled by 1/sqrt(hs) in
# bf16; K and V are written into the single (2, B, H, S, hs) f32 KV-cache output.
# ------------------------------------------------------------------
def _ln_qkv_kernel(x_ref, lnw_ref, lnb_ref, w_ref, b_ref, q_ref, kv_ref):
    H = q_ref.shape[1]
    hs = q_ref.shape[3]
    TS = x_ref.shape[1]
    D = H * hs
    inv_scale = 1.0 / math.sqrt(hs)

    x = x_ref[0]                                         # (TS, D) f32
    h = _layernorm(x, lnw_ref[...], lnb_ref[...])
    qkv = jnp.dot(h.astype(jnp.bfloat16), w_ref[...],
                  preferred_element_type=jnp.float32) + b_ref[...]   # (TS, 3D) f32

    def to_heads(m):                                     # (TS, D) -> (H, TS, hs)
        return m.reshape(TS, H, hs).transpose(1, 0, 2)

    q_ref[0] = (to_heads(qkv[:, :D]) * inv_scale).astype(jnp.bfloat16)
    kv_ref[0, 0] = to_heads(qkv[:, D:2 * D])             # K plane (f32 cache)
    kv_ref[1, 0] = to_heads(qkv[:, 2 * D:3 * D])         # V plane (f32 cache)


# ------------------------------------------------------------------
# Kernel B: flash-style causal attention, all heads batched in one einsum.
# grid = (B, Q-tiles, KV-tiles); KV axis is the "arbitrary" reduction axis.
# KV blocks for future tiles are not re-DMA'd (index_map clamps to qi).
# ------------------------------------------------------------------
def _attn_kernel(q_ref, kv_ref, o_ref, m_sc, l_sc, acc_sc):
    qi = pl.program_id(1)
    ki = pl.program_id(2)
    H, TQ, hs = acc_sc.shape
    TK = kv_ref.shape[3]

    @pl.when(ki == 0)
    def _():
        m_sc[...] = jnp.full_like(m_sc, -jnp.inf)
        l_sc[...] = jnp.zeros_like(l_sc)
        acc_sc[...] = jnp.zeros_like(acc_sc)

    def process(masked):
        q = q_ref[0]                                     # (H, TQ, hs) bf16, pre-scaled
        k = kv_ref[0, 0].astype(jnp.bfloat16)            # (H, TK, hs)
        v = kv_ref[1, 0].astype(jnp.bfloat16)
        s = jnp.einsum('hqd,hkd->hqk', q, k,
                       preferred_element_type=jnp.float32)           # (H, TQ, TK)
        if masked:                                       # diagonal tile only
            row = qi * TQ + jax.lax.broadcasted_iota(jnp.int32, (TQ, TK), 0)
            col = ki * TK + jax.lax.broadcasted_iota(jnp.int32, (TQ, TK), 1)
            s = jnp.where((col <= row)[None, :, :], s, MIN_FP16)

        m_prev = m_sc[...]
        m_new = jnp.maximum(m_prev, jnp.max(s, axis=-1, keepdims=True))
        alpha = jnp.exp(m_prev - m_new)
        p = jnp.exp(s - m_new)
        l_sc[...] = alpha * l_sc[...] + jnp.sum(p, axis=-1, keepdims=True)
        acc_sc[...] = alpha * acc_sc[...] + jnp.einsum(
            'hqk,hkd->hqd', p.astype(jnp.bfloat16), v,
            preferred_element_type=jnp.float32)
        m_sc[...] = m_new

    @pl.when(ki == qi)        # diagonal tile: needs the causal mask
    def _():
        process(masked=True)

    @pl.when(ki < qi)         # interior tile: fully below the diagonal, no mask
    def _():
        process(masked=False)

    @pl.when(ki == pl.num_programs(2) - 1)
    def _():
        out = acc_sc[...] * pl.reciprocal(l_sc[...], approx=True)    # (H, TQ, hs)
        # merge heads head-major into the lane dim (== transpose(1,2).view(B,S,D))
        # with one transpose + one lane-dense store.
        o_ref[0] = out.transpose(1, 0, 2).reshape(TQ, H * hs).astype(jnp.bfloat16)


# ------------------------------------------------------------------
# Kernel C: attention output projection + residual + ln2 + MLP + residual,
# with the MLP streamed over d_ff tiles (innermost "arbitrary" grid axis).
# x1 / ln2(x1) / the MLP accumulator live in VMEM scratch across d_ff tiles.
# ------------------------------------------------------------------
def _attnout_mlp_kernel(x_ref, ctx_ref, wo_ref, bo_ref, ln2w_ref, ln2b_ref,
                        w1_ref, b1_ref, w2_ref, b2_ref, y_ref,
                        x1_sc, h_sc, acc_sc):
    j = pl.program_id(2)

    @pl.when(j == 0)
    def _():
        attn_o = jnp.dot(ctx_ref[0], wo_ref[...],
                         preferred_element_type=jnp.float32) + bo_ref[...]
        x1 = x_ref[0] + attn_o
        x1_sc[...] = x1
        h = _layernorm(x1, ln2w_ref[...], ln2b_ref[...])
        h_sc[...] = h.astype(jnp.bfloat16)
        acc_sc[...] = jnp.zeros_like(acc_sc)

    f1 = jnp.dot(h_sc[...], w1_ref[...],
                 preferred_element_type=jnp.float32) + b1_ref[...]   # (TS, TF)
    g = jax.nn.gelu(f1, approximate=False)               # exact GELU == nn.GELU()
    acc_sc[...] += jnp.dot(g.astype(jnp.bfloat16), w2_ref[...],
                           preferred_element_type=jnp.float32)

    @pl.when(j == pl.num_programs(2) - 1)
    def _():
        y_ref[0] = x1_sc[...] + acc_sc[...] + b2_ref[...]


# ------------------------------------------------------------------
# Kernel D: final LayerNorm + decoder, vocab-tiled.  The LN'ed hidden is
# computed once per row tile (j == 0) into bf16 scratch and reused.
# ------------------------------------------------------------------
def _final_kernel(x_ref, lnw_ref, lnb_ref, dec_ref, out_ref, h_sc):
    @pl.when(pl.program_id(2) == 0)
    def _():
        h = _layernorm(x_ref[0], lnw_ref[...], lnb_ref[...])
        h_sc[...] = h.astype(jnp.bfloat16)
    out_ref[0] = jnp.dot(h_sc[...], dec_ref[...],
                         preferred_element_type=jnp.float32)


# ------------------------------------------------------------------
# Wrappers
# ------------------------------------------------------------------
def transformer_block(x, bp, num_head):
    B, S, D = x.shape
    hs = D // num_head
    d_ff = 4 * D
    TS = _divisor_tile(S, ROW_TILE, 8)
    TF = _divisor_tile(d_ff, FF_TILE, 128)

    # attention tile (query tile == key tile); shrink if the f32 KV blocks
    # (double-buffered) would eat more than half the VMEM budget (v7x: 64 MiB).
    TA = _divisor_tile(S, ATTN_TILE, 8)
    while TA > 128 and TA % 2 == 0 and 2 * (2 * num_head * TA * hs * 4) > VMEM_LIMIT // 2:
        TA //= 2

    cparams_rows = pltpu.CompilerParams(
        dimension_semantics=("parallel", "parallel"),
        vmem_limit_bytes=VMEM_LIMIT)

    # Pre-permute proj weight columns from the torch per-head [q_h | k_h | v_h]
    # slabs to [Q head-major | K head-major | V head-major] so in-kernel slices
    # are D-aligned.  TODO(synk): hoist this permutation into one-time param prep.
    perm = jnp.arange(3 * D, dtype=jnp.int32).reshape(num_head, 3, hs)
    perm = perm.transpose(1, 0, 2).reshape(-1)
    w_qkv = bp['proj_w'][:, perm].astype(jnp.bfloat16)
    b_qkv = bp['proj_b'][perm].reshape(1, -1)

    # ---- Kernel A: ln1 + QKV projection (Q bf16, K/V -> (2,B,H,S,hs) f32 cache) ----
    q_s, kv = pl.pallas_call(
        _ln_qkv_kernel,
        grid=(B, S // TS),
        in_specs=[
            pl.BlockSpec((1, TS, D), lambda b, s: (b, s, 0)),
            _resident((1, D)), _resident((1, D)),
            _resident((D, 3 * D)), _resident((1, 3 * D)),
        ],
        out_specs=(
            pl.BlockSpec((1, num_head, TS, hs), lambda b, s: (b, 0, s, 0)),
            pl.BlockSpec((2, 1, num_head, TS, hs), lambda b, s: (0, b, 0, s, 0)),
        ),
        out_shape=(
            jax.ShapeDtypeStruct((B, num_head, S, hs), jnp.bfloat16),
            jax.ShapeDtypeStruct((2, B, num_head, S, hs), jnp.float32),
        ),
        compiler_params=cparams_rows,
    )(x, _vec(bp['ln1_w']), _vec(bp['ln1_b']), w_qkv, b_qkv)

    # ---- Kernel B: flash attention (all heads batched, causal DMA skip) ----
    ctx = pl.pallas_call(
        _attn_kernel,
        grid=(B, S // TA, S // TA),
        in_specs=[
            pl.BlockSpec((1, num_head, TA, hs), lambda b, qi, ki: (b, 0, qi, 0)),
            pl.BlockSpec((2, 1, num_head, TA, hs),
                         lambda b, qi, ki: (0, b, 0, jnp.minimum(ki, qi), 0)),
        ],
        out_specs=pl.BlockSpec((1, TA, D), lambda b, qi, ki: (b, qi, 0)),
        out_shape=jax.ShapeDtypeStruct((B, S, D), jnp.bfloat16),
        scratch_shapes=[
            pltpu.VMEM((num_head, TA, 1), jnp.float32),
            pltpu.VMEM((num_head, TA, 1), jnp.float32),
            pltpu.VMEM((num_head, TA, hs), jnp.float32),
        ],
        compiler_params=pltpu.CompilerParams(
            dimension_semantics=("parallel", "parallel", "arbitrary"),
            vmem_limit_bytes=VMEM_LIMIT),
    )(q_s, kv)

    # ---- Kernel C: out-proj + residual + ln2 + streamed MLP + residual ----
    y = pl.pallas_call(
        _attnout_mlp_kernel,
        grid=(B, S // TS, d_ff // TF),
        in_specs=[
            pl.BlockSpec((1, TS, D), lambda b, s, j: (b, s, 0)),
            pl.BlockSpec((1, TS, D), lambda b, s, j: (b, s, 0)),
            _resident((D, D)), _resident((1, D)),
            _resident((1, D)), _resident((1, D)),
            _buffered_spec((D, TF), lambda b, s, j: (0, j), 3),
            pl.BlockSpec((1, TF), lambda b, s, j: (0, j)),
            _buffered_spec((TF, D), lambda b, s, j: (j, 0), 3),
            _resident((1, D)),
        ],
        out_specs=pl.BlockSpec((1, TS, D), lambda b, s, j: (b, s, 0)),
        out_shape=jax.ShapeDtypeStruct((B, S, D), jnp.float32),
        scratch_shapes=[
            pltpu.VMEM((TS, D), jnp.float32),    # x1 (post-attention residual)
            pltpu.VMEM((TS, D), jnp.bfloat16),   # ln2(x1) reused across d_ff tiles
            pltpu.VMEM((TS, D), jnp.float32),    # MLP accumulator
        ],
        compiler_params=pltpu.CompilerParams(
            dimension_semantics=("parallel", "parallel", "arbitrary"),
            vmem_limit_bytes=VMEM_LIMIT),
    )(x, ctx,
      bp['attn_out_w'].astype(jnp.bfloat16), _vec(bp['attn_out_b']),
      _vec(bp['ln2_w']), _vec(bp['ln2_b']),
      bp['ff1_w'].astype(jnp.bfloat16), _vec(bp['ff1_b']),
      bp['ff2_w'].astype(jnp.bfloat16), _vec(bp['ff2_b']))

    # kv is already the (2, B, H, S, hs) cache the reference would have stacked.
    return y, kv


def final_ln_decoder(x, ln_w, ln_b, dec_w):
    B, S, D = x.shape
    V = dec_w.shape[1]
    TS = _divisor_tile(S, ROW_TILE, 8)
    TN = _divisor_tile(V, VOCAB_TILE, 128)
    return pl.pallas_call(
        _final_kernel,
        grid=(B, S // TS, V // TN),
        in_specs=[
            pl.BlockSpec((1, TS, D), lambda b, s, j: (b, s, 0)),
            pl.BlockSpec((1, D), lambda b, s, j: (0, 0)),
            pl.BlockSpec((1, D), lambda b, s, j: (0, 0)),
            _buffered_spec((D, TN), lambda b, s, j: (0, j), 3),
        ],
        out_specs=pl.BlockSpec((1, TS, TN), lambda b, s, j: (b, s, j)),
        out_shape=jax.ShapeDtypeStruct((B, S, V), jnp.float32),
        scratch_shapes=[pltpu.VMEM((TS, D), jnp.bfloat16)],
        compiler_params=pltpu.CompilerParams(
            dimension_semantics=("parallel", "parallel", "arbitrary"),
            vmem_limit_bytes=VMEM_LIMIT),
    )(x, ln_w.reshape(1, D), ln_b.reshape(1, D), dec_w.astype(jnp.bfloat16))


# ------------------------------------------------------------------
# MyModel forward (y=None path): logits + next_prefix_kv_list
# ------------------------------------------------------------------
def my_model_forward(params, token_ids, prefix_kv_list=None):
    # TODO(synk): prefix_kv_list consumption (incremental decoding) and the
    # cross-entropy training loss are not implemented; only the prefix-free
    # inference path (prefix_kv_list=None, y=None) is reproduced. Dropout is
    # identity (eval mode). Embedding gathers run as plain XLA ops.
    B, S = token_ids.shape
    pos_ids = jnp.arange(S, dtype=jnp.int32)
    x = (jnp.take(params['emb'], token_ids, axis=0)
         + jnp.take(params['pos'], pos_ids, axis=0)[None, :, :])
    next_kvs = []
    for bp in params['blocks']:
        x, kv = transformer_block(x, bp, params['num_head'])
        next_kvs.append(kv)
    logits = final_ln_decoder(x, params['ln_w'], params['ln_b'], params['dec_w'])
    return logits, next_kvs


# ------------------------------------------------------------------
# Deterministic parameter initialization (shapes from MyModel.__init__)
# ------------------------------------------------------------------
def init_params(key, vocab, d_model, num_head, max_len, num_block):
    d_ff = 4 * d_model
    keys = iter(jax.random.split(key, 64))

    def nrm(shape, scale=0.02):
        return (scale * jax.random.normal(next(keys), shape)).astype(jnp.float32)

    params = {
        'num_head': num_head,
        'emb': nrm((vocab, d_model)),
        'pos': nrm((max_len, d_model)),
        'ln_w': jnp.ones((d_model,), jnp.float32),
        'ln_b': jnp.zeros((d_model,), jnp.float32),
        'dec_w': nrm((d_model, vocab)),     # Linear(d_model, vocab, bias=False)
        'blocks': [],
    }
    for _ in range(num_block):
        params['blocks'].append({
            'ln1_w': jnp.ones((d_model,), jnp.float32),
            'ln1_b': jnp.zeros((d_model,), jnp.float32),
            'proj_w': nrm((d_model, 3 * d_model)),
            'proj_b': jnp.zeros((3 * d_model,), jnp.float32),
            'attn_out_w': nrm((d_model, d_model)),
            'attn_out_b': jnp.zeros((d_model,), jnp.float32),
            'ln2_w': jnp.ones((d_model,), jnp.float32),
            'ln2_b': jnp.zeros((d_model,), jnp.float32),
            'ff1_w': nrm((d_model, d_ff)),
            'ff1_b': jnp.zeros((d_ff,), jnp.float32),
            'ff2_w': nrm((d_ff, d_model)),
            'ff2_b': jnp.zeros((d_model,), jnp.float32),
        })
    return params


if __name__ == "__main__":
    # Small shapes consistent with MyModel(vocab, pad_token_id, d_model, num_head, max_len, num_block)
    vocab, pad_token_id = 128, 0
    d_model, num_head, max_len, num_block = 32, 4, 16, 2
    B, S = 2, 8

    key = jax.random.PRNGKey(0)
    pkey, xkey = jax.random.split(key)
    params = init_params(pkey, vocab, d_model, num_head, max_len, num_block)
    token_ids = jax.random.randint(xkey, (B, S), 0, vocab, dtype=jnp.int32)

    logits, kv_list = my_model_forward(params, token_ids)
    jax.block_until_ready(logits)
    jax.block_until_ready(kv_list)

    assert logits.shape == (B, S, vocab)
    assert kv_list[0].shape == (2, B, num_head, S, d_model // num_head)
    assert kv_list[0].dtype == jnp.float32
    print("KERNEL_OK")
</pallas_src>

<mosaic_0001>
module attributes {stable_mosaic.version = 11 : i64} {
  func.func @_ln_qkv_kernel(%arg0: i32, %arg1: i32, %arg2: memref<1x8x32xf32, #tpu.memory_space<vmem>>, %arg3: memref<1x32xf32, #tpu.memory_space<vmem>>, %arg4: memref<1x32xf32, #tpu.memory_space<vmem>>, %arg5: memref<32x96xbf16, #tpu.memory_space<vmem>>, %arg6: memref<1x96xf32, #tpu.memory_space<vmem>>, %arg7: memref<1x4x8x8xbf16, #tpu.memory_space<vmem>>, %arg8: memref<2x1x4x8x8xf32, #tpu.memory_space<vmem>>) attributes {dimension_semantics = [#tpu.dimension_semantics<parallel>, #tpu.dimension_semantics<parallel>], iteration_bounds = array<i64: 2, 1>, scalar_prefetch = 0 : i64, scratch_operands = 0 : i64, tpu.core_type = #tpu.core_type<tc>, window_params = [{transform_indices = @transform_0, window_bounds = array<i64: 1, 8, 32>}, {pipeline_mode = #tpu.pipeline_mode<synchronous>, transform_indices = @transform_1, window_bounds = array<i64: 1, 32>}, {pipeline_mode = #tpu.pipeline_mode<synchronous>, transform_indices = @transform_2, window_bounds = array<i64: 1, 32>}, {pipeline_mode = #tpu.pipeline_mode<synchronous>, transform_indices = @transform_3, window_bounds = array<i64: 32, 96>}, {pipeline_mode = #tpu.pipeline_mode<synchronous>, transform_indices = @transform_4, window_bounds = array<i64: 1, 96>}, {transform_indices = @transform_5, window_bounds = array<i64: 1, 4, 8, 8>}, {transform_indices = @transform_6, window_bounds = array<i64: 2, 1, 4, 8, 8>}]} {
    %c0 = arith.constant 0 : index
    %c0_0 = arith.constant 0 : index
    %c0_1 = arith.constant 0 : index
    %0 = vector.load %arg2[%c0, %c0_0, %c0_1] : memref<1x8x32xf32, #tpu.memory_space<vmem>>, vector<1x8x32xf32>
    %1 = vector.shape_cast %0 : vector<1x8x32xf32> to vector<8x32xf32>
    %c0_2 = arith.constant 0 : index
    %c0_3 = arith.constant 0 : index
    %2 = vector.load %arg3[%c0_2, %c0_3] : memref<1x32xf32, #tpu.memory_space<vmem>>, vector<1x32xf32>
    %c0_4 = arith.constant 0 : index
    %c0_5 = arith.constant 0 : index
    %3 = vector.load %arg4[%c0_4, %c0_5] : memref<1x32xf32, #tpu.memory_space<vmem>>, vector<1x32xf32>
    %cst = arith.constant dense<0.000000e+00> : vector<8xf32>
    %4 = vector.multi_reduction <add>, %1, %cst [1] : vector<8x32xf32> to vector<8xf32>
    %5 = vector.shape_cast %4 : vector<8xf32> to vector<8x1xf32>
    %cst_6 = arith.constant 3.200000e+01 : f32
    %6 = vector.broadcast %cst_6 : f32 to vector<8x1xf32>
    %7 = arith.divf %5, %6 : vector<8x1xf32>
    %8 = vector.broadcast %7 : vector<8x1xf32> to vector<8x32xf32>
    %9 = arith.subf %1, %8 : vector<8x32xf32>
    %10 = arith.mulf %9, %9 : vector<8x32xf32>
    %cst_7 = arith.constant dense<0.000000e+00> : vector<8xf32>
    %11 = vector.multi_reduction <add>, %10, %cst_7 [1] : vector<8x32xf32> to vector<8xf32>
    %12 = vector.shape_cast %11 : vector<8xf32> to vector<8x1xf32>
    %cst_8 = arith.constant 3.200000e+01 : f32
    %13 = vector.broadcast %cst_8 : f32 to vector<8x1xf32>
    %14 = arith.divf %12, %13 : vector<8x1xf32>
    %15 = vector.broadcast %7 : vector<8x1xf32> to vector<8x32xf32>
    %16 = arith.subf %1, %15 : vector<8x32xf32>
    %17 = vector.broadcast %2 : vector<1x32xf32> to vector<8x32xf32>
    %18 = arith.mulf %17, %16 : vector<8x32xf32>
    %cst_9 = arith.constant 9.99999996E-13 : f32
    %19 = vector.broadcast %cst_9 : f32 to vector<8x1xf32>
    %20 = arith.addf %14, %19 : vector<8x1xf32>
    %21 = vector.broadcast %20 : vector<8x1xf32> to vector<8x32xf32>
    %22 = arith.divf %18, %21 : vector<8x32xf32>
    %23 = vector.broadcast %3 : vector<1x32xf32> to vector<8x32xf32>
    %24 = arith.addf %22, %23 : vector<8x32xf32>
    %25 = arith.truncf %24 : vector<8x32xf32> to vector<8x32xbf16>
    %c0_10 = arith.constant 0 : index
    %c0_11 = arith.constant 0 : index
    %26 = vector.load %arg5[%c0_10, %c0_11] : memref<32x96xbf16, #tpu.memory_space<vmem>>, vector<32x96xbf16>
    %cst_12 = arith.constant dense<0.000000e+00> : vector<8x96xf32>
    %27 = tpu.matmul %25, %26, %cst_12 {dimension_numbers = #tpu.dot_dimension_numbers<[1], [0], [0], [1], [0, 0, 1, 1], [], []>} : vector<8x32xbf16>, vector<32x96xbf16>, vector<8x96xf32> -> vector<8x96xf32>
    %c0_13 = arith.constant 0 : index
    %c0_14 = arith.constant 0 : index
    %28 = vector.load %arg6[%c0_13, %c0_14] : memref<1x96xf32, #tpu.memory_space<vmem>>, vector<1x96xf32>
    %29 = vector.broadcast %28 : vector<1x96xf32> to vector<8x96xf32>
    %30 = arith.addf %27, %29 : vector<8x96xf32>
    %31 = vector.extract_strided_slice %30 {offsets = [0, 0], sizes = [8, 32], strides = [1, 1]} : vector<8x96xf32> to vector<8x32xf32>
    %32 = vector.shape_cast %31 : vector<8x32xf32> to vector<8x4x8xf32>
    %33 = tpu.transpose %32, [1, 0, 2] : vector<8x4x8xf32> -> vector<4x8x8xf32>
    %cst_15 = arith.constant 0.353553385 : f32
    %34 = vector.broadcast %cst_15 : f32 to vector<4x8x8xf32>
    %35 = arith.mulf %33, %34 : vector<4x8x8xf32>
    %36 = arith.truncf %35 : vector<4x8x8xf32> to vector<4x8x8xbf16>
    %c0_16 = arith.constant 0 : index
    %c0_17 = arith.constant 0 : index
    %c0_18 = arith.constant 0 : index
    %c0_19 = arith.constant 0 : index
    %37 = vector.load %arg7[%c0_16, %c0_17, %c0_18, %c0_19] : memref<1x4x8x8xbf16, #tpu.memory_space<vmem>>, vector<1x4x8x8xbf16>
    %38 = vector.shape_cast %37 : vector<1x4x8x8xbf16> to vector<4x8x8xbf16>
    %39 = vector.shape_cast %36 : vector<4x8x8xbf16> to vector<1x4x8x8xbf16>
    tpu.vector_store %arg7[%c0_16, %c0_17, %c0_18, %c0_19], %39 {strides = array<i32>} : memref<1x4x8x8xbf16, #tpu.memory_space<vmem>>, vector<1x4x8x8xbf16>,
    %40 = vector.extract_strided_slice %30 {offsets = [0, 32], sizes = [8, 32], strides = [1, 1]} : vector<8x96xf32> to vector<8x32xf32>
    %41 = vector.shape_cast %40 : vector<8x32xf32> to vector<8x4x8xf32>
    %42 = tpu.transpose %41, [1, 0, 2] : vector<8x4x8xf32> -> vector<4x8x8xf32>
    %c0_20 = arith.constant 0 : index
    %c0_21 = arith.constant 0 : index
    %c0_22 = arith.constant 0 : index
    %c0_23 = arith.constant 0 : index
    %c0_24 = arith.constant 0 : index
    %43 = vector.load %arg8[%c0_20, %c0_21, %c0_22, %c0_23, %c0_24] : memref<2x1x4x8x8xf32, #tpu.memory_space<vmem>>, vector<1x1x4x8x8xf32>
    %44 = vector.shape_cast %43 : vector<1x1x4x8x8xf32> to vector<4x8x8xf32>
    %45 = vector.shape_cast %42 : vector<4x8x8xf32> to vector<1x1x4x8x8xf32>
    tpu.vector_store %arg8[%c0_20, %c0_21, %c0_22, %c0_23, %c0_24], %45 {strides = array<i32>} : memref<2x1x4x8x8xf32, #tpu.memory_space<vmem>>, vector<1x1x4x8x8xf32>,
    %46 = vector.extract_strided_slice %30 {offsets = [0, 64], sizes = [8, 32], strides = [1, 1]} : vector<8x96xf32> to vector<8x32xf32>
    %47 = vector.shape_cast %46 : vector<8x32xf32> to vector<8x4x8xf32>
    %48 = tpu.transpose %47, [1, 0, 2] : vector<8x4x8xf32> -> vector<4x8x8xf32>
    %c1 = arith.constant 1 : index
    %c0_25 = arith.constant 0 : index
    %c0_26 = arith.constant 0 : index
    %c0_27 = arith.constant 0 : index
    %c0_28 = arith.constant 0 : index
    %49 = vector.load %arg8[%c1, %c0_25, %c0_26, %c0_27, %c0_28] : memref<2x1x4x8x8xf32, #tpu.memory_space<vmem>>, vector<1x1x4x8x8xf32>
    %50 = vector.shape_cast %49 : vector<1x1x4x8x8xf32> to vector<4x8x8xf32>
    %51 = vector.shape_cast %48 : vector<4x8x8xf32> to vector<1x1x4x8x8xf32>
    tpu.vector_store %arg8[%c1, %c0_25, %c0_26, %c0_27, %c0_28], %51 {strides = array<i32>} : memref<2x1x4x8x8xf32, #tpu.memory_space<vmem>>, vector<1x1x4x8x8xf32>,
    return
  }
  func.func @transform_0(%arg0: i32, %arg1: i32) -> (i32, i32, i32) {
    %c0_i32 = arith.constant 0 : i32
    %c0_i32_0 = arith.constant 0 : i32
    return %arg0, %arg1, %c0_i32 : i32, i32, i32
  }
  func.func @transform_1(%arg0: i32, %arg1: i32) -> (i32, i32) {
    %c0_i32 = arith.constant 0 : i32
    %c0_i32_0 = arith.constant 0 : i32
    %c0_i32_1 = arith.constant 0 : i32
    return %c0_i32, %c0_i32_0 : i32, i32
  }
  func.func @transform_2(%arg0: i32, %arg1: i32) -> (i32, i32) {
    %c0_i32 = arith.constant 0 : i32
    %c0_i32_0 = arith.constant 0 : i32
    %c0_i32_1 = arith.constant 0 : i32
    return %c0_i32, %c0_i32_0 : i32, i32
  }
  func.func @transform_3(%arg0: i32, %arg1: i32) -> (i32, i32) {
    %c0_i32 = arith.constant 0 : i32
    %c0_i32_0 = arith.constant 0 : i32
    %c0_i32_1 = arith.constant 0 : i32
    return %c0_i32, %c0_i32_0 : i32, i32
  }
  func.func @transform_4(%arg0: i32, %arg1: i32) -> (i32, i32) {
    %c0_i32 = arith.constant 0 : i32
    %c0_i32_0 = arith.constant 0 : i32
    %c0_i32_1 = arith.constant 0 : i32
    return %c0_i32, %c0_i32_0 : i32, i32
  }
  func.func @transform_5(%arg0: i32, %arg1: i32) -> (i32, i32, i32, i32) {
    %c0_i32 = arith.constant 0 : i32
    %c0_i32_0 = arith.constant 0 : i32
    %c0_i32_1 = arith.constant 0 : i32
    return %arg0, %c0_i32, %arg1, %c0_i32_0 : i32, i32, i32, i32
  }
  func.func @transform_6(%arg0: i32, %arg1: i32) -> (i32, i32, i32, i32, i32) {
    %c0_i32 = arith.constant 0 : i32
    %c0_i32_0 = arith.constant 0 : i32
    %c0_i32_1 = arith.constant 0 : i32
    %c0_i32_2 = arith.constant 0 : i32
    return %c0_i32, %arg0, %c0_i32_0, %arg1, %c0_i32_1 : i32, i32, i32, i32, i32
  }
}

</mosaic_0001>

<bundles_post_ra>
// kernel: tpu_custom_call.1
= control target key start
LH: loop header
LB: loop body
LE: loop exit
PB: predicated region body
PF: predicated region fallthrough
CT: control target
= control target key end

     0   :  { %s1764_s0 = inlined_call_operand.hbm [shape: f32[2,8,32], index: 0, kind: input, shape index: {}]   ;;  %s1765_s1 = inlined_call_operand.vmem [shape: f32[1,32], index: 1, kind: input, shape index: {}]   ;;  %s1766_s2 = inlined_call_operand.vmem [shape: f32[1,32], index: 2, kind: input, shape index: {}]   ;;  %s1767_s3 = inlined_call_operand.hbm [shape: bf16[32,96], index: 3, kind: input, shape index: {}]   ;;  %s1768_s4 = inlined_call_operand.vmem [shape: f32[1,96], index: 4, kind: input, shape index: {}]   ;;  %s1769_s5 = inlined_call_operand.hbm [shape: bf16[2,4,8,8], index: 5, kind: output, shape index: {0}]   ;;  %s1770_s6 = inlined_call_operand.hbm [shape: f32[2,2,4,8,8], index: 6, kind: output, shape index: {1}]  }
   0x1   :  { %1775 = sst [smem:[#allocation16_spill]] %s1767_s3 }
   0x2   :  { %12 = vsyncpa [#allocation3], 0 }
   0x3   :  { %14 = vsyncpa [#allocation3 + $0x1], 0 }
   0x4   :  { %15 = vsyncpa [#allocation6], 0 }
   0x5   :  { %16 = vsyncpa [#allocation4], 0 }
   0x6   :  { %18 = vsyncpa [#allocation4 + $0x1], 0 }
   0x7   :  { %19 = vsyncpa [#allocation9], 0 }
   0x8   :  { %21 = vsyncpa [#allocation9 + $0x1], 0  ;;  %s1434_s21 = smov 0   ;;  %s1436_s22 = smov 0  }
   0x9   :  { %s1438_s23 = smov 0   ;;  %s1440_s24 = smov 0  }
   0xa   :  { %s1442_s25 = smov 0   ;;  %s1444_s26 = smov 0  }
   0xb LB: > { %s1071_s27 = sadd.s32 4294967295, %s1375_s26   ;;  %s1072_s28 = sadd.s32 4294967294, %s1375_s26   ;;  %s1375_s26 = sphi %s1444_s26, %s27_s26   ;;  %s1371_s25 = sphi %s1442_s25, %s1796_s25   ;;  %s1367_s24 = sphi %s1440_s24, %s1795_s24   ;;  %s1363_s23 = sphi %s1438_s23, %s1794_s23   ;;  %s1359_s22 = sphi %s1436_s22, %s1793_s22   ;;  %s1355_s21 = sphi %s1434_s21, %s1792_s21  }
   0xc   : > { %p61_p0 = scmp.ne.s32.totalorder %s1359_s22, %s1355_s21  ;;  %p1468_p1 = scmp.eq.s32.totalorder %s1071_s27, 0 }
   0xd   : > { %p1472_p2 = scmp.eq.s32.totalorder %s1071_s27, 1  ;;  %p177_p3 = scmp.eq.s32.totalorder %s1072_s28, 1 }
   0xe   : > { %s1776_s29 = scalar_select %p1468_p1, 1, 0 }
   0xf   : > { %s1777_s30 = scalar_select %p1472_p2, 1, 0 }
  0x10   : > { %p1478_p4 = por %p1468_p1, %p61_p0  ;;  %p1073_p5 = scmp.ge.s32.totalorder %s1375_s26, 1 }
  0x11   : > { %p1483_p6 = por %p177_p3, %p61_p0  ;;  %p212_p7 = scmp.lt.s32.totalorder %s1375_s26, 3 }
  0x12   : > { %s1778_s7 = scalar_select %p1478_p4, 1, 0 }
  0x13   : > { %s1779_s8 = scalar_select %p1483_p6, 1, 0 }
  0x14   : > { %p1488_p8 = pnand %p1073_p5, %p212_p7  ;;  %s1377_s10 = smov [#allocation5]  }
  0x15   : > { %s230_s11 = sshll.u32 %s1377_s10, 4  ;;  %s39_s13 = sadd.s32 1, %s1371_s25  ;;  %s231_s11 = int_to_ptr.vmem [resolvable:$true] %s230_s11 }
  0x16   : > { %s1780_s9 = scalar_select %p1488_p8, 1, 0 }
  0x17   : > { %p1136_p9 = pneg %p1488_p8  ;;  %s1782_s3 = sld [smem:[#allocation16_spill]] }
  0x19   : > { %p1497_p11 = pnand %p1136_p9, %p1468_p1 }
  0x1b   : > { %p1229_p13 = pneg %p1497_p11 }
  0x1d   : > { %s1227_s16 = scalar_lea.hbm %s1782_s3, 256 }
  0x1e   : > { %p1228_p12 = scmp.ne.s32.totalorder %s1782_s3, %s1227_s16  ;;  %p1234_p5 = scmp.lt.u32.totalorder %s1227_s16, %s1782_s3 }
  0x20   : > { %p1230_p0 = pnand %p1229_p13, %p1228_p12 }
  0x22   : > { %p1231_p3 = pneg %p1230_p0 }
  0x24   : > { %p1236_p7 = pnand %p1234_p5, %p1231_p3 }
  0x26   : > { %1239 = shalt.err (!%p1236_p7)
}
  0x27   : > { %s1240_s27 = scalar_lea.vmem %s231_s11, 256  ;;  %p1248_p1 = scmp.lt.s32.totalorder %s231_s11, %s231_s11 }
  0x28   : > { %p1241_p9 = scmp.ne.s32.totalorder %s231_s11, %s1240_s27  ;;  %p1249_p4 = scmp.lt.s32.totalorder %s1240_s27, %s1240_s27 }
  0x2a   : > { %p1243_p10 = pnand %p1241_p9, %p1229_p13  ;;  %p1250_p8 = por %p1249_p4, %p1248_p1 }
  0x2c   : > { %p1244_p6 = pneg %p1243_p10 }
  0x2e   : > { %p1251_p2 = pnand %p1250_p8, %p1244_p6 }
  0x30   : > { %1254 = shalt.err (!%p1251_p2)
}
  0x31   : > { %s1378_s28 = smov 64   ;;  %s1379_s10 = smov 4  }
  0x32   : > { %1139 = dma.hbm_to_vmem [thread:$0]  (!%p1497_p11), %s1782_s3, 256, %s231_s11, [#allocation6], %s1378_s28, %s1378_s28, %s1379_s10  }
  0x33   : > { %p41_p1 = scmp.ge.s32.totalorder %s39_s13, 2  ;;  %s48_s16 = sadd.s32 1, %s1363_s23 }
  0x34   : > { %p55_p2 = scmp.ne.s32.totalorder %s1363_s23, %s1359_s22  ;;  %p56_p4 = scmp.eq.s32.totalorder %s1375_s26, 0 }
  0x35   : > { %s1798_s13 = smov (%p41_p1, %s39_s13), 0  ;;  %p1784_p8 = scmp.ne.s32.totalorder %s1777_s30, 0 }
  0x36   : > { %p1524_p6 = por %p56_p4, %p55_p2  ;;  %s43_s12 = ssub.s32 %s1371_s25, %s1798_s13 }
  0x37   : > { %p1530_p10 = por %p1784_p8, %p55_p2  ;;  %p1152_p12 = scmp.lt.s32.totalorder %s1375_s26, 2 }
  0x38   : > { %p46_p11 = scmp.eq.s32.totalorder %s43_s12, 0  ;;  %s247_s11 = sand.u32 1, %s1363_s23  }
  0x39   : > { %s1076_s19 = sshll.u32 %s247_s11, 3  ;;  %s1077_s27 = sshll.u32 %s1371_s25, 7 }
  0x3a   : > { %s1539_s20 = scalar_select %p46_p11, %s1363_s23, %s48_s16  }
  0x3b   : > { %s1545_s14 = scalar_lea.hbm %s1764_s0, %s1077_s27  ;;  %s251_s30 = scalar_lea.vmem [#allocation2], %s1076_s19 }
  0x3c   : > { %s259_s15 = sshll.u32 %s251_s30, 4  ;;  %p1551_p13 = pnand %p1152_p12, %p1524_p6  ;;  %s1547_s15 = int_to_ptr.vmem [resolvable:$true] %s259_s15 }
  0x3d   : > { %s248_s16 = scalar_lea.sflag [#allocation3], %s247_s11  ;;  %s1255_s3 = scalar_lea.hbm %s1545_s14, 128 }
  0x3e   : > { %p1256_p0 = scmp.ne.s32.totalorder %s1545_s14, %s1255_s3  ;;  %p1257_p3 = pneg %p1551_p13 }
  0x3f   : > { %s1260_s28 = scalar_lea.hbm %s1764_s0, 256  ;;  %p1261_p9 = scmp.lt.u32.totalorder %s1545_s14, %s1764_s0 }
  0x40   : > { %p1258_p5 = pnand %p1257_p3, %p1256_p0  ;;  %p1262_p1 = scmp.lt.u32.totalorder %s1260_s28, %s1255_s3 }
  0x41   : > { %p1264_p4 = scmp.lt.u32.totalorder %s1255_s3, %s1545_s14 }
  0x42   : > { %p1259_p7 = pneg %p1258_p5  ;;  %p1263_p2 = por %p1262_p1, %p1261_p9 }
  0x44   : > { %p1265_p6 = por %p1264_p4, %p1263_p2 }
  0x46   : > { %p1266_p8 = pnand %p1265_p6, %p1259_p7 }
  0x48   : > { %1269 = shalt.err (!%p1266_p8)
}
  0x49   : > { %s1270_s11 = scalar_lea.vmem %s1547_s15, 128  ;;  %s1380_s30 = smov [#allocation2]  }
  0x4a   : > { %p1271_p12 = scmp.ne.s32.totalorder %s1547_s15, %s1270_s11  ;;  %s1275_s19 = sshll.u32 %s1380_s30, 4  ;;  %s1276_s19 = int_to_ptr.vmem [resolvable:$false] %s1275_s19 }
  0x4b   : > { %s1277_s27 = scalar_lea.vmem %s1276_s19, 256  ;;  %p1278_p5 = scmp.lt.s32.totalorder %s1547_s15, %s1276_s19 }
  0x4c   : > { %p1273_p11 = pnand %p1271_p12, %p1257_p3  ;;  %p1279_p9 = scmp.lt.s32.totalorder %s1277_s27, %s1270_s11 }
  0x4e   : > { %p1274_p0 = pneg %p1273_p11  ;;  %p1280_p1 = por %p1279_p9, %p1278_p5 }
  0x50   : > { %p1281_p2 = pnand %p1280_p1, %p1274_p0 }
  0x52   : > { %1284 = shalt.err (!%p1281_p2)
}
  0x53   : > { %1143 = dma.hbm_to_vmem [thread:$0]  (!%p1551_p13), %s1545_s14, 128, %s1547_s15, %s248_s16  }
  0x54   : > { %p1787_p7 = scmp.ne.s32.totalorder %s1780_s9, 0 }
  0x55   : > { %s1583_s3 = sand.u32 (!%p1787_p7), 1, %s1359_s22   ;;  %p1788_p3 = scmp.ne.s32.totalorder (!%p1787_p7), %s1778_s7, 0 }
  0x56   : > { %268 = sbr.rel (%p1787_p7) target bundleno = 902 (0x386), region = 40  ;;  %s1079_s28 = sshll.u32 (!%p1787_p7), %s1583_s3, 3 }
  0x57   : > { %s271_s17 = scalar_lea.sflag (!%p1787_p7), [#allocation3], %s1583_s3  ;;  %s274_s10 = scalar_lea.vmem (!%p1787_p7), [#allocation2], %s1079_s28 }
  0x5d   : > { %1338 = dma.done.wait (%p1788_p3), %s271_s17, 128  }
  0x5e   : > { %1340 = vsyncadd (%p1788_p3), %s271_s17, 4294967168  ;;  %p1789_p4 = scmp.ne.s32.totalorder %s1776_s29, 0 }
  0x60   : > { %1342 = dma.done.wait (%p1789_p4), [#allocation6], 256  }
  0x61   : > { %1344 = vsyncadd (%p1789_p4), [#allocation6], 4294967040  ;;  %vm316_vm0 = vcmask 261120   ;;  %v313_v0 = vld [vmem:[%s274_s10] sm:$0xff]  ;;  %v1223_v7 = vld [vmem:[#allocation5] sm:$0xff]   ;;  %v1381_v8 = vmov 0.0   ;;  %v427_v28 = vlaneseq }
  0x62   : > { %v317_v1 = vsel %vm316_vm0, %v313_v0, 0.0  ;;  %1112 = vmatprep.subr.bf16.mxu0 %v1381_v8  ;;  %vm1382_vm1 = vmmov 0   ;;  %v1224_v9 = vld [vmem:[#allocation5 + $0x8] sm:$0xff]   ;;  %v1083_v13 = vld [vmem:[%s1765_s1] ss:$0 sm:$0xff]  ;;  %s1383_s16 = smov 104  }
  0x63   : > { %318 = vadd.xlane.f32.xlu0 %v317_v1  ;;  %1116 = vmatprep.mubr.msk.bf16.mxu0 %vm1382_vm1, %v1381_v8  ;;  %v1084_v16 = vld [vmem:[%s1766_s2] ss:$0 sm:$0xff]  ;;  %s1384_s11 = smov 120   ;;  %s1385_s30 = smov 112   ;;  %v1388_v26 = vmov 1983009808  }
  0x64   : > { %1113 = vmatpush3.bf16.msra.mxu0 %v1223_v7  ;;  %v1085_v20 = vld [vmem:[%s1768_s4] ss:$0 sm:$0xff]  ;;  %s1386_s19 = smov 96   ;;  %s1387_s27 = smov 64   ;;  %v425_v27 = vunpack.c.l.s4 %v1388_v26  ;;  %v1389_v29 = vmov 1934713408  }
  0x65   : > { %1114 = vmatprep.subr.bf16.mxu0 %v1381_v8  ;;  %v457_v30 = vunpack.c.l.s4 %v1389_v29  ;;  %v428_v32 = vshrl.u32 %v427_v28, 7  ;;  %s1081_s28 = sshll.u32 %s1583_s3, 4  ;;  %s1107_s17 = sshll.u32 %s1367_s24, 8  ;;  %vm566_vm2 = vcmask 60416  }
  0x66   : > { %v426_v31 = vunpack.c.0.s8 %v425_v27  ;;  %s304_s10 = scalar_lea.vmem [#allocation7], %s1081_s28  ;;  %s1640_s14 = scalar_lea.hbm %s1769_s5, %s1107_s17 }
  0x67   : > { %v458_v35 = vunpack.c.0.s8 %v457_v30  ;;  %s897_s29 = sshll.u32 %s304_s10, 4  ;;  %s878_s15 = scalar_lea.sflag [#allocation4], %s1583_s3  ;;  %s1642_s29 = int_to_ptr.vmem [resolvable:$true] %s897_s29 }
  0x68   : > { %1115 = vmatpush3.bf16.msra.mxu0 %v1224_v9  ;;  %v1610_v36 = vsub.s32 %v426_v31, %v428_v32  ;;  %s1285_s12 = scalar_lea.vmem %s1642_s29, 256 }
  0x69   : > { %v1614_v42 = vsub.s32 %v458_v35, %v428_v32  ;;  %p1286_p13 = scmp.ne.s32.totalorder %s1642_s29, %s1285_s12 }
  0x6b   : > { %p1287_p6 = pnand %p1286_p13, %p1530_p10 }
  0x6d   : > { %p1288_p8 = pneg %p1287_p6 }
  0xf0   : > { %v319_v2 = vpop.xlane.xlu0 %318 }
  0xf1   : > { %v321_v3 = vmul.f32 0.03125, %v319_v2 }
  0xf3   : > { %v322_v4 = vsub.f32 %v313_v0, %v321_v3 }
  0xf5   : > { %v323_v5 = vmul.f32 %v322_v4, %v322_v4  ;;  %v334_v14 = vmul.f32 %v1083_v13, %v322_v4 }
  0xf7   : > { %v324_v6 = vsel %vm316_vm0, %v323_v5, 0.0 }
  0xf8   : > { %325 = vadd.xlane.f32.xlu0 %v324_v6 }
 0x185   : > { %v326_v10 = vpop.xlane.xlu0 %325 }
 0x186   : > { %v327_v11 = vmul.f32 0.03125, %v326_v10 }
 0x188   : > { %v335_v12 = vadd.f32 1e-12, %v327_v11 }
 0x18a   : > { %1225 = vrcp.f32 %v335_v12 }
 0x194   : > { %v1226_v15 = vpop.eup %1225 }
 0x195   : > { %v337_v17 = vmul.f32 %v1226_v15, %v334_v14 }
 0x197   : > { %v344_v18 = vadd.f32 %v1084_v16, %v337_v17 }
 0x199   : > { %v345_v19 = vpack.c.bf16 %v344_v18, %v344_v18 }
 0x19b   : > { %1117 = vmatmul.mubr.msk.bf16.vlgmr.msra.gmra.mrb[0].mxu0 %vm316_vm0, %v345_v19 }
 0x26e   : > { %v406_v21 = vpop.f32.mrb[0].mxu0 }
 0x26f   : > { %v407_v22 = vadd.f32 %v1085_v20, %v406_v21  ;;  %v1118_v23 = vpop.f32.mrb[1].mxu0 }
 0x270   : > { %v409_v24 = vpop.f32.mrb[2].mxu0 }
 0x271   : > { %419 = vrot.lane.b32.xlu0 %v407_v22, %s1383_s16  ;;  %413 = vrot.lane.b32.xlu1 %v407_v22, %s1384_s11  ;;  %v1119_v25 = vpop.f32.mrb[3].mxu0  ;;  %s1390_s16 = smov [#allocation7]  }
 0x272   : > { %s1289_s11 = sshll.u32 %s1390_s16, 4  ;;  %s1290_s11 = int_to_ptr.vmem [resolvable:$false] %s1289_s11 }
 0x273   : > { %p1292_p12 = scmp.lt.s32.totalorder %s1642_s29, %s1290_s11 }
 0x275   : > { %416 = vrot.lane.b32.xlu1 %v407_v22, %s1385_s30  ;;  %s1291_s30 = scalar_lea.vmem %s1290_s11, 512 }
 0x276   : > { %p1293_p11 = scmp.lt.s32.totalorder %s1291_s30, %s1285_s12 }
 0x278   : > { %p1294_p0 = por %p1293_p11, %p1292_p12 }
 0x279   : > { %571 = vrot.lane.b32.xlu1 %v407_v22, %s1386_s19 }
 0x27a   : > { %p1295_p5 = pnand %p1294_p0, %p1288_p8 }
 0x27d   : > { %724 = vrot.lane.b32.xlu1 %v407_v22, %s1387_s27 }
 0x2e3   : > { %v420_v33 = vpop.permute.xlu0 %419  ;;  %v414_v34 = vpop.permute.xlu1 %413 }
 0x2e4   : > { %573 = vrot.lane.b32.xlu1 %v414_v34, %s1386_s19  ;;  %v438_v37 = vcombine.low %v414_v34, %v420_v33  ;;  %v439_v38 = vcombine.high %v414_v34, %v420_v33 }
 0x2e6   : > { %v446_v43 = vrot.slane %v438_v37, %v1610_v36  ;;  %v453_v44 = vrot.slane %v439_v38, %v1610_v36 }
 0x2e7   : > { %v417_v39 = vpop.permute.xlu1 %416 }
 0x2e8   : > { %v422_v40 = vcombine.low %v407_v22, %v417_v39  ;;  %v423_v41 = vcombine.high %v407_v22, %v417_v39  ;;  %728 = vrot.lane.b32.xlu0 %v417_v39, %s1387_s27  ;;  %575 = vrot.lane.b32.xlu1 %v417_v39, %s1386_s19 }
 0x2ea   : > { %v430_v45 = vrot.slane %v422_v40, %v1610_v36  ;;  %v437_v46 = vrot.slane %v423_v41, %v1610_v36 }
 0x2ec   : > { %v454_v47 = vcombine.low %v430_v45, %v446_v43  ;;  %v455_v48 = vcombine.high %v430_v45, %v446_v43  ;;  %v470_v49 = vcombine.low %v437_v46, %v453_v44  ;;  %v471_v50 = vcombine.high %v437_v46, %v453_v44  ;;  %577 = vrot.lane.b32.xlu1 %v420_v33, %s1386_s19 }
 0x2ee   : > { %v462_v51 = vrot.slane %v454_v47, %v1614_v42  ;;  %v469_v52 = vrot.slane %v455_v48, %v1614_v42  ;;  %v478_v53 = vrot.slane %v470_v49, %v1614_v42  ;;  %v485_v54 = vrot.slane %v471_v50, %v1614_v42 }
 0x2f0   : > { %v490_v55 = vcombine.low %v462_v51, %v469_v52  ;;  %v1089_v56 = vcombine.high %v462_v51, %v469_v52  ;;  %v506_v57 = vcombine.low %v478_v53, %v485_v54  ;;  %v1090_v58 = vcombine.high %v478_v53, %v485_v54  ;;  %726 = vrot.lane.b32.xlu1 %v414_v34, %s1387_s27 }
 0x2f2   : > { %v497_v59 = vrot.slane %v490_v55, %v1610_v36  ;;  %v505_v60 = vrot.slane %v1089_v56, %v1610_v36  ;;  %v513_v61 = vrot.slane %v506_v57, %v1610_v36  ;;  %v521_v62 = vrot.slane %v1090_v58, %v1610_v36 }
 0x2f4   : > { %v522_v63 = vcombine.low %v497_v59, %v505_v60  ;;  %v523_v0 = vcombine.high %v497_v59, %v505_v60  ;;  %v538_v1 = vcombine.low %v513_v61, %v521_v62  ;;  %v539_v2 = vcombine.high %v513_v61, %v521_v62  ;;  %730 = vrot.lane.b32.xlu1 %v420_v33, %s1387_s27 }
 0x2f6   : > { %v530_v3 = vrot.slane %v522_v63, %v1614_v42  ;;  %v537_v4 = vrot.slane %v523_v0, %v1614_v42  ;;  %v546_v5 = vrot.slane %v538_v1, %v1614_v42  ;;  %v553_v6 = vrot.slane %v539_v2, %v1614_v42 }
 0x2f8   : > { %v554_v7 = vcombine.low %v530_v3, %v546_v5  ;;  %v555_v8 = vcombine.high %v530_v3, %v546_v5  ;;  %v556_v9 = vcombine.low %v537_v4, %v553_v6  ;;  %v557_v10 = vcombine.high %v537_v4, %v553_v6 }
 0x2fa   : > { %v558_v11 = vmul.f32 0.35355338, %v554_v7  ;;  %v559_v12 = vmul.f32 0.35355338, %v555_v8  ;;  %v560_v13 = vmul.f32 0.35355338, %v556_v9 }
 0x2fb   : > { %v561_v14 = vmul.f32 0.35355338, %v557_v10 }
 0x2fc   : > { %v562_v15 = vpack.c.bf16 %v558_v11, %v558_v11  ;;  %v563_v16 = vpack.c.bf16 %v559_v12, %v559_v12  ;;  %v564_v17 = vpack.c.bf16 %v560_v13, %v560_v13 }
 0x2fd   : > { %v565_v18 = vpack.c.bf16 %v561_v14, %v561_v14 }
 0x2fe   : > { %567 = vst.msk [vmem:[%s304_s10] sm:$0xf] %vm566_vm2, %v562_v15  ;;  %568 = vst.msk [vmem:[%s304_s10 + $0x4] sm:$0xf] %vm566_vm2, %v563_v16 }
 0x2ff   : > { %569 = vst.msk [vmem:[%s304_s10 + $0x8] sm:$0xf] %vm566_vm2, %v564_v17  ;;  %570 = vst.msk [vmem:[%s304_s10 + $0xc] sm:$0xf] %vm566_vm2, %v565_v18 }
 0x300   : > { %1298 = shalt.err (!%p1295_p5)
}
 0x301   : > { %s1299_s19 = scalar_lea.hbm %s1640_s14, 256  ;;  %s1303_s10 = scalar_lea.hbm %s1769_s5, 512 }
 0x302   : > { %p1300_p9 = scmp.ne.s32.totalorder %s1640_s14, %s1299_s19  ;;  %p1304_p7 = scmp.lt.u32.totalorder %s1640_s14, %s1769_s5 }
 0x303   : > { %p1305_p3 = scmp.lt.u32.totalorder %s1303_s10, %s1299_s19  ;;  %p1307_p13 = scmp.lt.u32.totalorder %s1299_s19, %s1640_s14 }
 0x304   : > { %p1301_p1 = pnand %p1300_p9, %p1530_p10 }
 0x305   : > { %p1306_p4 = por %p1305_p3, %p1304_p7 }
 0x306   : > { %p1302_p2 = pneg %p1301_p1 }
 0x307   : > { %p1308_p6 = por %p1307_p13, %p1306_p4 }
 0x309   : > { %p1309_p8 = pnand %p1308_p6, %p1302_p2 }
 0x30b   : > { %1312 = shalt.err (!%p1309_p8)
}
 0x30c   : > { %s1391_s12 = smov 4   ;;  %v572_v19 = vpop.permute.xlu1 %571  ;;  %vm719_vm3 = vcmask 64512  }
 0x30d   : > { %1126 = dma.vmem_to_hbm [thread:$0]  (%p1530_p10), %s1642_s29, 256, %s1640_s14, %s878_s15, %s1387_s27, %s1387_s27, %s1391_s12  }
 0x30e   : > { %s1082_s27 = sshll.u32 %s1583_s3, 6  ;;  %s883_s14 = scalar_lea.sflag [#allocation9], %s1583_s3 }
 0x30f   : > { %s1695_s29 = scalar_lea.vmem [#allocation8], %s1082_s27 }
 0x310   : > { %v725_v20 = vpop.permute.xlu1 %724 }
 0x356   : > { %v574_v21 = vpop.permute.xlu1 %573 }
 0x35a   : > { %v576_v22 = vpop.permute.xlu1 %575  ;;  %v729_v33 = vpop.permute.xlu0 %728 }
 0x35b   : > { %v583_v23 = vcombine.low %v572_v19, %v576_v22  ;;  %v584_v24 = vcombine.high %v572_v19, %v576_v22  ;;  %v736_v44 = vcombine.low %v725_v20, %v729_v33  ;;  %v737_v45 = vcombine.high %v725_v20, %v729_v33 }
 0x35d   : > { %v591_v28 = vrot.slane %v583_v23, %v1610_v36  ;;  %v598_v29 = vrot.slane %v584_v24, %v1610_v36  ;;  %v744_v57 = vrot.slane %v736_v44, %v1610_v36  ;;  %v751_v58 = vrot.slane %v737_v45, %v1610_v36 }
 0x35e   : > { %v578_v25 = vpop.permute.xlu1 %577 }
 0x35f   : > { %v599_v26 = vcombine.low %v574_v21, %v578_v25  ;;  %v600_v27 = vcombine.high %v574_v21, %v578_v25 }
 0x361   : > { %v607_v30 = vrot.slane %v599_v26, %v1610_v36  ;;  %v614_v31 = vrot.slane %v600_v27, %v1610_v36 }
 0x362   : > { %v727_v32 = vpop.permute.xlu1 %726 }
 0x363   : > { %v615_v34 = vcombine.low %v591_v28, %v607_v30  ;;  %v616_v35 = vcombine.high %v591_v28, %v607_v30  ;;  %v631_v37 = vcombine.low %v598_v29, %v614_v31  ;;  %v632_v38 = vcombine.high %v598_v29, %v614_v31 }
 0x365   : > { %v623_v39 = vrot.slane %v615_v34, %v1614_v42  ;;  %v630_v40 = vrot.slane %v616_v35, %v1614_v42  ;;  %v639_v41 = vrot.slane %v631_v37, %v1614_v42  ;;  %v646_v43 = vrot.slane %v632_v38, %v1614_v42 }
 0x366   : > { %v731_v46 = vpop.permute.xlu1 %730 }
 0x367   : > { %v651_v47 = vcombine.low %v623_v39, %v630_v40  ;;  %v1091_v48 = vcombine.high %v623_v39, %v630_v40  ;;  %v667_v49 = vcombine.low %v639_v41, %v646_v43  ;;  %v1092_v50 = vcombine.high %v639_v41, %v646_v43 }
 0x368   : > { %v752_v51 = vcombine.low %v727_v32, %v731_v46  ;;  %v753_v52 = vcombine.high %v727_v32, %v731_v46 }
 0x369   : > { %v658_v53 = vrot.slane %v651_v47, %v1610_v36  ;;  %v666_v54 = vrot.slane %v1091_v48, %v1610_v36  ;;  %v674_v55 = vrot.slane %v667_v49, %v1610_v36  ;;  %v682_v56 = vrot.slane %v1092_v50, %v1610_v36 }
 0x36a   : > { %v760_v59 = vrot.slane %v752_v51, %v1610_v36  ;;  %v767_v60 = vrot.slane %v753_v52, %v1610_v36 }
 0x36b   : > { %v683_v61 = vcombine.low %v658_v53, %v666_v54  ;;  %v684_v62 = vcombine.high %v658_v53, %v666_v54  ;;  %v699_v63 = vcombine.low %v674_v55, %v682_v56  ;;  %v700_v0 = vcombine.high %v674_v55, %v682_v56 }
 0x36c   : > { %v768_v1 = vcombine.low %v744_v57, %v760_v59  ;;  %v769_v2 = vcombine.high %v744_v57, %v760_v59  ;;  %v784_v3 = vcombine.low %v751_v58, %v767_v60  ;;  %v785_v4 = vcombine.high %v751_v58, %v767_v60 }
 0x36d   : > { %v691_v5 = vrot.slane %v683_v61, %v1614_v42  ;;  %v698_v6 = vrot.slane %v684_v62, %v1614_v42  ;;  %v707_v7 = vrot.slane %v699_v63, %v1614_v42  ;;  %v714_v8 = vrot.slane %v700_v0, %v1614_v42 }
 0x36e   : > { %v776_v9 = vrot.slane %v768_v1, %v1614_v42  ;;  %v783_v10 = vrot.slane %v769_v2, %v1614_v42  ;;  %v792_v11 = vrot.slane %v784_v3, %v1614_v42  ;;  %v799_v12 = vrot.slane %v785_v4, %v1614_v42 }
 0x36f   : > { %v715_v13 = vcombine.low %v691_v5, %v707_v7  ;;  %v716_v14 = vcombine.high %v691_v5, %v707_v7  ;;  %v717_v15 = vcombine.low %v698_v6, %v714_v8  ;;  %v718_v16 = vcombine.high %v698_v6, %v714_v8 }
 0x370   : > { %v804_v17 = vcombine.low %v776_v9, %v783_v10  ;;  %v1093_v18 = vcombine.high %v776_v9, %v783_v10  ;;  %v820_v19 = vcombine.low %v792_v11, %v799_v12  ;;  %v1094_v20 = vcombine.high %v792_v11, %v799_v12 }
 0x371   : > { %720 = vst.msk [vmem:[%s1695_s29] sm:$0xff] %vm719_vm3, %v715_v13  ;;  %721 = vst.msk [vmem:[%s1695_s29 + $0x8] sm:$0xff] %vm719_vm3, %v716_v14 }
 0x372   : > { %722 = vst.msk [vmem:[%s1695_s29 + $0x10] sm:$0xff] %vm719_vm3, %v717_v15  ;;  %723 = vst.msk [vmem:[%s1695_s29 + $0x18] sm:$0xff] %vm719_vm3, %v718_v16  ;;  %v811_v21 = vrot.slane %v804_v17, %v1610_v36  ;;  %v819_v22 = vrot.slane %v1093_v18, %v1610_v36  ;;  %v827_v23 = vrot.slane %v820_v19, %v1610_v36 }
 0x373   : > { %v835_v24 = vrot.slane %v1094_v20, %v1610_v36 }
 0x374   : > { %v836_v25 = vcombine.low %v811_v21, %v819_v22  ;;  %v837_v26 = vcombine.high %v811_v21, %v819_v22 }
 0x375   : > { %v852_v27 = vcombine.low %v827_v23, %v835_v24  ;;  %v853_v28 = vcombine.high %v827_v23, %v835_v24 }
 0x376   : > { %v844_v29 = vrot.slane %v836_v25, %v1614_v42  ;;  %v851_v30 = vrot.slane %v837_v26, %v1614_v42 }
 0x377   : > { %v860_v31 = vrot.slane %v852_v27, %v1614_v42  ;;  %v867_v32 = vrot.slane %v853_v28, %v1614_v42 }
 0x379   : > { %v868_v33 = vcombine.low %v844_v29, %v860_v31  ;;  %v869_v34 = vcombine.high %v844_v29, %v860_v31  ;;  %v870_v35 = vcombine.low %v851_v30, %v867_v32  ;;  %v871_v37 = vcombine.high %v851_v30, %v867_v32 }
 0x37b   : > { %1095 = vst.msk [vmem:[%s1695_s29 + $0x20] sm:$0xff] %vm719_vm3, %v868_v33  ;;  %1096 = vst.msk [vmem:[%s1695_s29 + $0x28] sm:$0xff] %vm719_vm3, %v869_v34 }
 0x37c   : > { %1097 = vst.msk [vmem:[%s1695_s29 + $0x30] sm:$0xff] %vm719_vm3, %v870_v35  ;;  %1098 = vst.msk [vmem:[%s1695_s29 + $0x38] sm:$0xff] %vm719_vm3, %v871_v37 }
 0x37d   : > { %s1108_s15 = sshll.u32 %s1367_s24, 9  ;;  %s930_s16 = sshll.u32 %s1695_s29, 4  ;;  %s931_s16 = int_to_ptr.vmem [resolvable:$true] %s930_s16 }
 0x37e   : > { %s913_s19 = scalar_lea.hbm %s1770_s6, %s1108_s15  ;;  %s1392_s28 = smov 512  }
 0x37f   : > { %1127 = sst [smem:[#allocation11]] (%p1530_p10), %s1392_s28  ;;  %s1393_s3 = smov 1024  }
 0x380   : > { %1128 = sst [smem:[#allocation11 + $0x1]] (%p1530_p10), %s1393_s3  ;;  %s1394_s17 = smov 4  }
 0x381   : > { %1129 = sst [smem:[#allocation11 + $0x2]] (%p1530_p10), %s1394_s17  ;;  %s1395_s10 = smov 128  }
 0x382   : > { %1130 = sst [smem:[#allocation11 + $0x3]] (%p1530_p10), %s1395_s10  ;;  %s1396_s24 = smov 8  }
 0x383   : > { %1131 = sst [smem:[#allocation11 + $0x4]] (%p1530_p10), %s1395_s10  ;;  %s1397_s7 = smov [#allocation10]  }
 0x384   : > { %1132 = sst [smem:[#allocation11 + $0x5]] (%p1530_p10), %s1396_s24  ;;  %s1398_s9 = smov 0  }
 0x385   : > { %1133 = dma.general (%p1530_p10), %s931_s16, 1024, %s913_s19, %s883_s14, %s1397_s7, [#allocation11], %s1398_s9, 0  }
 0x386 PF: > { %s958_s12 = sand.u32 1, %s1355_s21   ;;  %p1790_p12 = scmp.ne.s32.totalorder %s1779_s8, 0 }
 0x387   : > { %p1791_p11 = scmp.ge.s32.totalorder %s1375_s26, 2  ;;  %s959_s27 = scalar_lea.sflag [#allocation4], %s958_s12 }
 0x389   : > { %p1145_p0 = pnand %p1791_p11, %p1790_p12 }
 0x38b   : > { %1346 = dma.done.wait (!%p1145_p0), %s959_s27, 256  }
 0x38c   : > { %1348 = vsyncadd (!%p1145_p0), %s959_s27, 4294967040  ;;  %s968_s29 = scalar_lea.sflag [#allocation9], %s958_s12 }
 0x38d   : > { %1350 = dma.done.wait (!%p1145_p0), %s968_s29, 1024  }
 0x38e   : > { %1352 = vsyncadd (!%p1145_p0), %s968_s29, 4294966272  ;;  %s27_s26 = sadd.s32 1, %s1375_s26   ;;  %s1792_s21 = smov %s1359_s22 }
 0x38f   : > { %p24_p5 = scmp.ge.s32.totalorder %s27_s26, 4   ;;  %s1793_s22 = smov %s1363_s23 }
 0x390   : > { %s1794_s23 = smov %s1539_s20  ;;  %s1795_s24 = smov %s1371_s25 }
 0x391   : > { %s1796_s25 = smov %s1798_s13  ;;  %26 = sbr.rel (!%p24_p5) target bundleno = 11 (0xb), region = 112 }
 0x398   :  { %973 = vsyncpa [#allocation3], 1 }
 0x399   :  { %975 = vsyncpa [#allocation3 + $0x1], 1 }
 0x39a   :  { %976 = vsyncpa [#allocation6], 1 }
 0x39b   :  { %977 = vsyncpa [#allocation4], 1 }
 0x39c   :  { %979 = vsyncpa [#allocation4 + $0x1], 1 }
 0x39d   :  { %980 = vsyncpa [#allocation9], 1 }
 0x39e   :  { %982 = vsyncpa [#allocation9 + $0x1], 1 }

</bundles_post_ra>
